<compile_context>
chip_gen: v6e
topology: v6e:2x2x1
jax: 0.10.0
libtpu: 0.0.40
codegen_flags: <defaults>
</compile_context>

<pallas_src>
import math

import jax
import jax.numpy as jnp
from jax.experimental import pallas as pl
from jax.experimental.pallas import tpu as pltpu

LANE = 128  # minimum lane-dense output width


def _fused_heads_kernel(x_ref, w_ref, c_ref, o_ref):
    # One MXU matmul computes all four heads (packed into nt <= 128 lanes).
    y = jnp.dot(x_ref[...], w_ref[...], preferred_element_type=jnp.float32)

    consts = c_ref[...]            # (5, nt) resident constants, hoisted
    bias = consts[0:1, :]
    a_sig = consts[1:2, :]         # per-column sigmoid scale
    b_off = consts[2:3, :]         # per-column additive offset
    c_tnh = consts[3:4, :]         # per-column tanh scale
    m_sq = consts[4:5, :]          # 1.0 on the 6 squashed columns, else 0.0
    y = y + bias

    # Single transcendental per element (stable: t in (0, 1]); sigmoid and
    # tanh are rebuilt with VPU ops + exact reciprocals (1e-5 tolerance).
    t = jnp.exp(-jnp.abs(y))
    t2 = t * t
    sig_abs = 1.0 / (1.0 + t)              # sigmoid(|y|)
    tnh_abs = (1.0 - t2) / (1.0 + t2)      # tanh(|y|)
    pos = y >= 0.0
    sig = jnp.where(pos, sig_abs, 1.0 - sig_abs)
    tnh = jnp.where(pos, tnh_abs, -tnh_abs)

    # One fused affine select replaces iota + 6 compares + 6 chained selects.
    squashed = b_off + a_sig * sig + c_tnh * tnh
    o_ref[...] = jnp.where(m_sq > 0.0, squashed, y).astype(o_ref.dtype)


def pack_params(w_dir, b_dir, w_left, b_left, w_right, b_right,
                w_straight, b_straight):
    """Pack the 4 heads (PyTorch (out,in) layout) into one pre-transposed
    lane-dense weight matrix plus a (5, nt) epilogue-constant block:
      row 0: bias | row 1: sigmoid scale | row 2: offset | row 3: tanh scale
      row 4: squash mask.  Done ONCE at init."""
    K = w_dir.shape[1]
    n = w_left.shape[0]
    assert n >= 2, "squash epilogue assumes num_outputs >= 2"
    cols = 3 + 3 * n
    nt = max(LANE, ((cols + LANE - 1) // LANE) * LANE)

    o_dir, o_l, o_r, o_s = 0, 3, 3 + n, 3 + 2 * n
    heads = [(w_dir, b_dir, o_dir), (w_left, b_left, o_l),
             (w_right, b_right, o_r), (w_straight, b_straight, o_s)]

    w_packed = jnp.zeros((K, nt), jnp.float32)
    consts = jnp.zeros((5, nt), jnp.float32)
    for w, b, off in heads:
        m = w.shape[0]
        w_packed = w_packed.at[:, off:off + m].set(w.T.astype(jnp.float32))
        consts = consts.at[0, off:off + m].set(b.astype(jnp.float32))

    # (column, sigmoid_scale, offset) for the 5 sigmoid-squashed columns.
    sig_cols = [(o_l + 0, 0.4, 0.4), (o_l + 1, 0.4, 0.6),
                (o_r + 0, 0.4, 0.4), (o_r + 1, -0.4, -0.6),
                (o_s + 0, 0.3, 0.7)]
    for col, a, b in sig_cols:
        consts = consts.at[1, col].set(a)
        consts = consts.at[2, col].set(b)
        consts = consts.at[4, col].set(1.0)
    # straight[:, 1] = tanh(.) / 2000
    consts = consts.at[3, o_s + 1].set(1.0 / 2000.0)
    consts = consts.at[4, o_s + 1].set(1.0)
    return w_packed, consts


def init_mixed_distribution_params(key, num_inputs, num_outputs):
    """nn.Linear default init U(-1/sqrt(fan_in), 1/sqrt(fan_in)) for all heads."""
    bound = 1.0 / math.sqrt(num_inputs)
    keys = jax.random.split(key, 8)

    def lin(kw, kb, n_out):
        w = jax.random.uniform(kw, (n_out, num_inputs), minval=-bound,
                               maxval=bound, dtype=jnp.float32)
        b = jax.random.uniform(kb, (n_out,), minval=-bound, maxval=bound,
                               dtype=jnp.float32)
        return w, b

    w_dir, b_dir = lin(keys[0], keys[1], 3)
    w_l, b_l = lin(keys[2], keys[3], num_outputs)
    w_r, b_r = lin(keys[4], keys[5], num_outputs)
    w_s, b_s = lin(keys[6], keys[7], num_outputs)
    raw = dict(w_dir=w_dir, b_dir=b_dir, w_left=w_l, b_left=b_l,
               w_right=w_r, b_right=b_r, w_straight=w_s, b_straight=b_s)
    packed = pack_params(w_dir, b_dir, w_l, b_l, w_r, b_r, w_s, b_s)
    return packed, raw


def _pick_batch_tile(B, tm_max):
    """Multiple-of-8 batch tile, <= tm_max, giving >=2 grid steps whenever
    possible so v7x's two TensorCores both get work."""
    if B <= 8:
        return B                       # single full-extent block
    half = (-(-B // 2) + 7) // 8 * 8   # round_up(ceil(B/2), 8)
    return max(8, min(tm_max, half))


def mixed_distribution_forward(x, w_packed, consts, num_outputs,
                               continuous_var=0.1, *, tm=1024):
    """Returns (direction, mean_left, mean_right, mean_straight, action_logstd)."""
    B, K = x.shape
    Kw, nt = w_packed.shape
    assert Kw == K and consts.shape == (5, nt)
    assert num_outputs >= 2 and 3 + 3 * num_outputs <= nt

    tile = _pick_batch_tile(B, tm)
    grid = (pl.cdiv(B, tile),)

    out = pl.pallas_call(
        _fused_heads_kernel,
        out_shape=jax.ShapeDtypeStruct((B, nt), jnp.float32),
        grid=grid,
        in_specs=[
            pl.BlockSpec((tile, K), lambda i: (i, 0)),   # x batch tile (no pad copy)
            pl.BlockSpec((K, nt), lambda i: (0, 0)),     # packed weights (resident)
            pl.BlockSpec((5, nt), lambda i: (0, 0)),     # bias + epilogue constants
        ],
        out_specs=pl.BlockSpec((tile, nt), lambda i: (i, 0)),
        compiler_params=pltpu.CompilerParams(
            dimension_semantics=("parallel",),           # megacore batch sharding
            vmem_limit_bytes=32 * 1024 * 1024),
        cost_estimate=pl.CostEstimate(
            flops=2 * B * K * nt,
            transcendentals=B * nt,
            bytes_accessed=4 * (B * K + K * nt + 5 * nt + B * nt)),
    )(x.astype(jnp.float32), w_packed, consts)

    n = num_outputs
    direction = out[:, 0:3]
    mean_left = out[:, 3:3 + n]
    mean_right = out[:, 3 + n:3 + 2 * n]
    mean_straight = out[:, 3 + 2 * n:3 + 3 * n]

    # Constant vector (args.continuous_var in the original); no kernel needed.
    action_logstd = jnp.log(jnp.sqrt(
        jnp.full((num_outputs,), continuous_var, jnp.float32)))
    return direction, mean_left, mean_right, mean_straight, action_logstd


def _reference_forward(x, raw, num_outputs, continuous_var):
    def lin(w, b):
        return x @ w.T + b

    def sig(v):
        return 1.0 / (1.0 + jnp.exp(-v))

    d = lin(raw["w_dir"], raw["b_dir"])
    l = lin(raw["w_left"], raw["b_left"])
    r = lin(raw["w_right"], raw["b_right"])
    s = lin(raw["w_straight"], raw["b_straight"])
    l = l.at[:, 0].set(0.4 + sig(l[:, 0]) * 2 / 5)
    l = l.at[:, 1].set(0.6 + sig(l[:, 1]) * 2 / 5)
    r = r.at[:, 0].set(0.4 + sig(r[:, 0]) * 2 / 5)
    r = r.at[:, 1].set(-0.6 - sig(r[:, 1]) * 2 / 5)
    s = s.at[:, 0].set(0.7 + sig(s[:, 0]) * 3 / 10)
    s = s.at[:, 1].set(jnp.tanh(s[:, 1]) * 1 / 2000)
    logstd = jnp.log(jnp.sqrt(
        jnp.full((num_outputs,), continuous_var, jnp.float32)))
    return d, l, r, s, logstd


if __name__ == "__main__":
    key = jax.random.PRNGKey(0)
    k_x, k_p = jax.random.split(key)

    batch, num_inputs, num_outputs = 16, 32, 8
    continuous_var = 0.1   # TODO(synk): args.continuous_var comes from external config.

    x = jax.random.normal(k_x, (batch, num_inputs), dtype=jnp.float32)
    (w_packed, consts), raw = init_mixed_distribution_params(
        k_p, num_inputs, num_outputs)

    # batch=16 -> auto tile=8 -> grid=(2,), so the batch-tiled pipeline runs >1 step.
    outs = mixed_distribution_forward(x, w_packed, consts, num_outputs,
                                      continuous_var)
    jax.block_until_ready(outs)

    refs = _reference_forward(x, raw, num_outputs, continuous_var)
    names = ["direction", "mean_left", "mean_right", "mean_straight", "logstd"]
    for name, got, want in zip(names, outs, refs):
        assert got.shape == want.shape, (name, got.shape, want.shape)
        assert jnp.allclose(got, want, atol=1e-5, rtol=1e-5), name

    # TODO(synk): sample()/logprobs_and_entropy() (softmax, multinomial sampling,
    # gather, mixture log-probs) are not part of forward(); not kernelized here.
    print("KERNEL_OK")
</pallas_src>

<mosaic_0001>
module attributes {stable_mosaic.version = 11 : i64} {
  func.func @_fused_heads_kernel(%arg0: i32, %arg1: memref<8x32xf32, #tpu.memory_space<vmem>>, %arg2: memref<32x128xf32, #tpu.memory_space<vmem>>, %arg3: memref<5x128xf32, #tpu.memory_space<vmem>>, %arg4: memref<8x128xf32, #tpu.memory_space<vmem>>) attributes {dimension_semantics = [#tpu.dimension_semantics<parallel>], iteration_bounds = array<i64: 2>, scalar_prefetch = 0 : i64, scratch_operands = 0 : i64, tpu.core_type = #tpu.core_type<tc>, window_params = [{transform_indices = @transform_0, window_bounds = array<i64: 8, 32>}, {pipeline_mode = #tpu.pipeline_mode<synchronous>, transform_indices = @transform_1, window_bounds = array<i64: 32, 128>}, {pipeline_mode = #tpu.pipeline_mode<synchronous>, transform_indices = @transform_2, window_bounds = array<i64: 5, 128>}, {transform_indices = @transform_3, window_bounds = array<i64: 8, 128>}]} {
    %c0 = arith.constant 0 : index
    %c0_0 = arith.constant 0 : index
    %0 = vector.load %arg1[%c0, %c0_0] : memref<8x32xf32, #tpu.memory_space<vmem>>, vector<8x32xf32>
    %c0_1 = arith.constant 0 : index
    %c0_2 = arith.constant 0 : index
    %1 = vector.load %arg2[%c0_1, %c0_2] : memref<32x128xf32, #tpu.memory_space<vmem>>, vector<32x128xf32>
    %cst = arith.constant dense<0.000000e+00> : vector<8x128xf32>
    %2 = tpu.matmul %0, %1, %cst {dimension_numbers = #tpu.dot_dimension_numbers<[1], [0], [0], [1], [0, 0, 1, 1], [], []>} : vector<8x32xf32>, vector<32x128xf32>, vector<8x128xf32> -> vector<8x128xf32>
    %c0_3 = arith.constant 0 : index
    %c0_4 = arith.constant 0 : index
    %3 = vector.load %arg3[%c0_3, %c0_4] : memref<5x128xf32, #tpu.memory_space<vmem>>, vector<5x128xf32>
    %4 = vector.extract_strided_slice %3 {offsets = [0, 0], sizes = [1, 128], strides = [1, 1]} : vector<5x128xf32> to vector<1x128xf32>
    %5 = vector.extract_strided_slice %3 {offsets = [1, 0], sizes = [1, 128], strides = [1, 1]} : vector<5x128xf32> to vector<1x128xf32>
    %6 = vector.extract_strided_slice %3 {offsets = [2, 0], sizes = [1, 128], strides = [1, 1]} : vector<5x128xf32> to vector<1x128xf32>
    %7 = vector.extract_strided_slice %3 {offsets = [3, 0], sizes = [1, 128], strides = [1, 1]} : vector<5x128xf32> to vector<1x128xf32>
    %8 = vector.extract_strided_slice %3 {offsets = [4, 0], sizes = [1, 128], strides = [1, 1]} : vector<5x128xf32> to vector<1x128xf32>
    %9 = vector.broadcast %4 : vector<1x128xf32> to vector<8x128xf32>
    %10 = arith.addf %2, %9 : vector<8x128xf32>
    %11 = math.absf %10 : vector<8x128xf32>
    %cst_5 = arith.constant 0.000000e+00 : f32
    %12 = vector.broadcast %cst_5 : f32 to vector<8x128xf32>
    %13 = arith.subf %12, %11 : vector<8x128xf32>
    %14 = math.exp %13 : vector<8x128xf32>
    %15 = arith.mulf %14, %14 : vector<8x128xf32>
    %cst_6 = arith.constant 1.000000e+00 : f32
    %16 = vector.broadcast %cst_6 : f32 to vector<8x128xf32>
    %17 = arith.addf %16, %14 : vector<8x128xf32>
    %cst_7 = arith.constant 1.000000e+00 : f32
    %18 = vector.broadcast %cst_7 : f32 to vector<8x128xf32>
    %19 = arith.divf %18, %17 : vector<8x128xf32>
    %cst_8 = arith.constant 1.000000e+00 : f32
    %20 = vector.broadcast %cst_8 : f32 to vector<8x128xf32>
    %21 = arith.subf %20, %15 : vector<8x128xf32>
    %cst_9 = arith.constant 1.000000e+00 : f32
    %22 = vector.broadcast %cst_9 : f32 to vector<8x128xf32>
    %23 = arith.addf %22, %15 : vector<8x128xf32>
    %24 = arith.divf %21, %23 : vector<8x128xf32>
    %cst_10 = arith.constant 0.000000e+00 : f32
    %25 = vector.broadcast %cst_10 : f32 to vector<8x128xf32>
    %26 = arith.cmpf oge, %10, %25 : vector<8x128xf32>
    %cst_11 = arith.constant 1.000000e+00 : f32
    %27 = vector.broadcast %cst_11 : f32 to vector<8x128xf32>
    %28 = arith.subf %27, %19 : vector<8x128xf32>
    %29 = arith.select %26, %19, %28 : vector<8x128xi1>, vector<8x128xf32>
    %cst_12 = arith.constant 0.000000e+00 : f32
    %30 = vector.broadcast %cst_12 : f32 to vector<8x128xf32>
    %31 = arith.subf %30, %24 : vector<8x128xf32>
    %32 = arith.select %26, %24, %31 : vector<8x128xi1>, vector<8x128xf32>
    %33 = vector.broadcast %5 : vector<1x128xf32> to vector<8x128xf32>
    %34 = arith.mulf %33, %29 : vector<8x128xf32>
    %35 = vector.broadcast %6 : vector<1x128xf32> to vector<8x128xf32>
    %36 = arith.addf %35, %34 : vector<8x128xf32>
    %37 = vector.broadcast %7 : vector<1x128xf32> to vector<8x128xf32>
    %38 = arith.mulf %37, %32 : vector<8x128xf32>
    %39 = arith.addf %36, %38 : vector<8x128xf32>
    %cst_13 = arith.constant 0.000000e+00 : f32
    %40 = vector.broadcast %cst_13 : f32 to vector<1x128xf32>
    %41 = arith.cmpf ogt, %8, %40 : vector<1x128xf32>
    %42 = vector.shape_cast %41 : vector<1x128xi1> to vector<1x128xi1>
    %43 = vector.broadcast %42 : vector<1x128xi1> to vector<8x128xi1>
    %44 = arith.select %43, %39, %10 : vector<8x128xi1>, vector<8x128xf32>
    %c0_14 = arith.constant 0 : index
    %c0_15 = arith.constant 0 : index
    %45 = vector.load %arg4[%c0_14, %c0_15] : memref<8x128xf32, #tpu.memory_space<vmem>>, vector<8x128xf32>
    tpu.vector_store %arg4[%c0_14, %c0_15], %44 {strides = array<i32>} : memref<8x128xf32, #tpu.memory_space<vmem>>, vector<8x128xf32>,
    return
  }
  func.func @transform_0(%arg0: i32) -> (i32, i32) {
    %c0_i32 = arith.constant 0 : i32
    %c0_i32_0 = arith.constant 0 : i32
    return %arg0, %c0_i32 : i32, i32
  }
  func.func @transform_1(%arg0: i32) -> (i32, i32) {
    %c0_i32 = arith.constant 0 : i32
    %c0_i32_0 = arith.constant 0 : i32
    %c0_i32_1 = arith.constant 0 : i32
    return %c0_i32, %c0_i32_0 : i32, i32
  }
  func.func @transform_2(%arg0: i32) -> (i32, i32) {
    %c0_i32 = arith.constant 0 : i32
    %c0_i32_0 = arith.constant 0 : i32
    %c0_i32_1 = arith.constant 0 : i32
    return %c0_i32, %c0_i32_0 : i32, i32
  }
  func.func @transform_3(%arg0: i32) -> (i32, i32) {
    %c0_i32 = arith.constant 0 : i32
    %c0_i32_0 = arith.constant 0 : i32
    return %arg0, %c0_i32 : i32, i32
  }
}

</mosaic_0001>

<bundles_post_ra>
// kernel: tpu_custom_call.1
= control target key start
LH: loop header
LB: loop body
LE: loop exit
PB: predicated region body
PF: predicated region fallthrough
CT: control target
= control target key end

     0   :  { %8 = vsyncpa [#allocation3], 0  ;;  %s907_s0 = inlined_call_operand.hbm [shape: f32[16,32], index: 0, kind: input, shape index: {}]   ;;  %s908_s1 = inlined_call_operand.hbm [shape: f32[32,128], index: 1, kind: input, shape index: {}]   ;;  %s909_s2 = inlined_call_operand.hbm [shape: f32[5,128], index: 2, kind: input, shape index: {}]   ;;  %s910_s3 = inlined_call_operand.hbm [shape: f32[16,128], index: 3, kind: output, shape index: {}]  }
   0x1   :  { %10 = vsyncpa [#allocation3 + $0x1], 0 }
   0x2   :  { %11 = vsyncpa [#allocation6], 0 }
   0x3   :  { %12 = vsyncpa [#allocation4], 0 }
   0x4   :  { %14 = vsyncpa [#allocation4 + $0x1], 0  ;;  %s732_s12 = smov 0   ;;  %s734_s13 = smov 0  }
   0x5   :  { %s736_s14 = smov 0   ;;  %s738_s15 = smov 0  }
   0x6 LB: > { %s753_s16 = sadd.s32 4294967295, %s701_s15   ;;  %s442_s17 = sadd.s32 4294967294, %s701_s15   ;;  %s701_s15 = sphi %s738_s15, %s932_s15   ;;  %s697_s14 = sphi %s736_s14, %s931_s14   ;;  %s693_s13 = sphi %s734_s13, %s930_s13   ;;  %s689_s12 = sphi %s732_s12, %s929_s12  }
   0x7   : > { %p40_p0 = scmp.ne.s32.totalorder %s693_s13, %s689_s12  ;;  %p911_p1 = scmp.eq.s32.totalorder %s753_s16, 0 }
   0x8   : > { %p112_p3 = scmp.eq.s32.totalorder %s442_s17, 1  ;;  %p443_p5 = scmp.ge.s32.totalorder %s701_s15, 1 }
   0x9   : > { %p762_p4 = por %p911_p1, %p40_p0  ;;  %p119_p7 = scmp.lt.s32.totalorder %s701_s15, 3 }
   0xa   : > { %p767_p6 = por %p112_p3, %p40_p0  ;;  %s703_s21 = smov [#allocation5]  }
   0xb   : > { %s915_s18 = scalar_select %p762_p4, 1, 0 }
   0xc   : > { %s916_s19 = scalar_select %p767_p6, 1, 0 }
   0xd   : > { %p772_p8 = pnand %p443_p5, %p119_p7  ;;  %s131_s22 = sshll.u32 %s703_s21, 4  ;;  %s132_s22 = int_to_ptr.vmem [resolvable:$true] %s131_s22 }
   0xe   : > { %s704_s24 = smov [#allocation7]   ;;  %s564_s26 = scalar_lea.vmem %s132_s22, 512 }
   0xf   : > { %s917_s20 = scalar_select %p772_p8, 1, 0 }
  0x10   : > { %p487_p9 = pneg %p772_p8  ;;  %s145_s25 = sshll.u32 %s704_s24, 4  ;;  %s146_s25 = int_to_ptr.vmem [resolvable:$true] %s145_s25 }
  0x11   : > { %p565_p13 = scmp.ne.s32.totalorder %s132_s22, %s564_s26  ;;  %p572_p5 = scmp.lt.s32.totalorder %s132_s22, %s132_s22 }
  0x12   : > { %p781_p11 = pnand %p487_p9, %p911_p1  ;;  %p573_p7 = scmp.lt.s32.totalorder %s564_s26, %s564_s26 }
  0x14   : > { %p555_p12 = pneg %p781_p11  ;;  %p574_p10 = por %p573_p7, %p572_p5 }
  0x16   : > { %p567_p0 = pnand %p565_p13, %p555_p12 }
  0x18   : > { %p568_p3 = pneg %p567_p0 }
  0x1a   : > { %p575_p9 = pnand %p574_p10, %p568_p3 }
  0x1c   : > { %578 = shalt.err (!%p575_p9)
}
  0x1d   : > { %s705_s27 = smov 128   ;;  %s706_s28 = smov 8  }
  0x1e   : > { %490 = dma.hbm_to_vmem [thread:$0]  (!%p781_p11), %s908_s1, 512, %s132_s22, [#allocation6], %s705_s27, %s705_s27, %s706_s28  }
  0x1f   : > { %s590_s4 = scalar_lea.vmem %s146_s25, 128  ;;  %p598_p2 = scmp.lt.s32.totalorder %s146_s25, %s146_s25 }
  0x20   : > { %p591_p1 = scmp.ne.s32.totalorder %s146_s25, %s590_s4  ;;  %p599_p6 = scmp.lt.s32.totalorder %s590_s4, %s590_s4 }
  0x22   : > { %p593_p13 = pnand %p591_p1, %p555_p12  ;;  %p600_p5 = por %p599_p6, %p598_p2 }
  0x24   : > { %p594_p0 = pneg %p593_p13 }
  0x26   : > { %p601_p10 = pnand %p600_p5, %p594_p0 }
  0x28   : > { %604 = shalt.err (!%p601_p10)
}
  0x29   : > { %493 = dma.hbm_to_vmem [thread:$0]  (!%p781_p11), %s909_s2, 128, %s146_s25, [#allocation6]  }
  0x2a   : > { %s804_s7 = sadd.s32 1, %s701_s15   ;;  %s27_s8 = sadd.s32 1, %s697_s14 }
  0x2b   : > { %s24_s9 = ssub.s32 %s701_s15, %s804_s7  ;;  %p34_p1 = scmp.ne.s32.totalorder %s697_s14, %s693_s13 }
  0x2c   : > { %p25_p2 = scmp.eq.s32.totalorder %s24_s9, 0  ;;  %p35_p6 = scmp.eq.s32.totalorder %s701_s15, 0 }
  0x2d   : > { %p919_p12 = scmp.eq.s32.totalorder %s753_s16, 1  ;;  %p504_p7 = scmp.lt.s32.totalorder %s701_s15, 2 }
  0x2e   : > { %s820_s11 = scalar_select %p25_p2, %s697_s14, %s27_s8  }
  0x2f   : > { %p814_p3 = por %p919_p12, %p34_p1  ;;  %p36_p9 = por %p35_p6, %p34_p1 }
  0x30   : > { %s156_s17 = sand.u32 1, %s697_s14   ;;  %s448_s22 = sshll.u32 %s701_s15, 7 }
  0x31   : > { %s920_s10 = scalar_select %p814_p3, 1, 0 }
  0x32   : > { %s447_s21 = sshll.u32 %s156_s17, 3  ;;  %s827_s25 = scalar_lea.hbm %s907_s0, %s448_s22 }
  0x33   : > { %s160_s26 = scalar_lea.vmem [#allocation2], %s447_s21  ;;  %p829_p11 = pnand %p504_p7, %p36_p9 }
  0x34   : > { %s167_s27 = sshll.u32 %s160_s26, 4  ;;  %s157_s29 = scalar_lea.sflag [#allocation3], %s156_s17  ;;  %s168_s27 = int_to_ptr.vmem [resolvable:$true] %s167_s27 }
  0x35   : > { %s605_s30 = scalar_lea.hbm %s827_s25, 128  ;;  %p607_p0 = pneg %p829_p11 }
  0x36   : > { %p606_p13 = scmp.ne.s32.totalorder %s827_s25, %s605_s30  ;;  %s610_s6 = scalar_lea.hbm %s907_s0, 256 }
  0x37   : > { %p611_p1 = scmp.lt.s32.totalorder %s827_s25, %s907_s0  ;;  %p612_p2 = scmp.lt.s32.totalorder %s610_s6, %s605_s30 }
  0x38   : > { %p608_p5 = pnand %p607_p0, %p606_p13 }
  0x39   : > { %p613_p6 = por %p612_p2, %p611_p1 }
  0x3a   : > { %p609_p10 = pneg %p608_p5 }
  0x3c   : > { %p614_p12 = pnand %p613_p6, %p609_p10 }
  0x3e   : > { %617 = shalt.err (!%p614_p12)
}
  0x3f   : > { %s618_s21 = scalar_lea.vmem %s168_s27, 128  ;;  %s707_s17 = smov [#allocation2]  }
  0x40   : > { %p619_p7 = scmp.ne.s32.totalorder %s168_s27, %s618_s21  ;;  %s623_s22 = sshll.u32 %s707_s17, 4  ;;  %s624_s22 = int_to_ptr.vmem [resolvable:$false] %s623_s22 }
  0x41   : > { %s625_s23 = scalar_lea.vmem %s624_s22, 256  ;;  %p626_p13 = scmp.lt.s32.totalorder %s168_s27, %s624_s22 }
  0x42   : > { %p621_p9 = pnand %p619_p7, %p607_p0  ;;  %p627_p5 = scmp.lt.s32.totalorder %s625_s23, %s618_s21 }
  0x44   : > { %p622_p3 = pneg %p621_p9  ;;  %p628_p4 = por %p627_p5, %p626_p13 }
  0x46   : > { %p629_p8 = pnand %p628_p4, %p622_p3 }
  0x48   : > { %632 = shalt.err (!%p629_p8)
}
  0x49   : > { %497 = dma.hbm_to_vmem [thread:$0]  (!%p829_p11), %s827_s25, 128, %s168_s27, %s157_s29  }
  0x4a   : > { %p922_p10 = scmp.ne.s32.totalorder %s917_s20, 0 }
  0x4b   : > { %s850_s24 = sand.u32 (!%p922_p10), 1, %s693_s13   ;;  %p923_p4 = scmp.ne.s32.totalorder (!%p922_p10), %s915_s18, 0 }
  0x4c   : > { %176 = sbr.rel (%p922_p10) target bundleno = 350 (0x15e), region = 32  ;;  %s450_s26 = sshll.u32 (!%p922_p10), %s850_s24, 3 }
  0x4d   : > { %s179_s30 = scalar_lea.sflag (!%p922_p10), [#allocation3], %s850_s24  ;;  %s182_s4 = scalar_lea.vmem (!%p922_p10), [#allocation2], %s450_s26 }
  0x51   : > { %676 = dma.done.wait (%p923_p4), %s179_s30, 128  }
  0x52   : > { %678 = vsyncadd (%p923_p4), %s179_s30, 4294967168  ;;  %p924_p8 = scmp.eq.s32.totalorder %s753_s16, 0 }
  0x54   : > { %680 = dma.done.wait (%p924_p8), [#allocation6], 640   ;;  %p925_p3 = pmov %p924_p8 }
  0x55   : > { %v708_v0 = vmov 0.0   ;;  %vm709_vm0 = vmmov 0   ;;  %v217_v1 = vld [vmem:[#allocation5 + $0x18] sm:$0xff]  ;;  %v216_v2 = vld [vmem:[#allocation5 + $0x10] sm:$0xff]  ;;  %v215_v3 = vld [vmem:[#allocation5 + $0x8] sm:$0xff]  ;;  %vm223_vm1 = vcmask 261120   ;;  %v219_v6 = vlaneseq }
  0x56   : > { %682 = vsyncadd (%p925_p3), [#allocation6], 4294966656  ;;  %464 = vmatprep.subr.mxu0 %v708_v0  ;;  %472 = vmatprep.mubr.msk.f32.mxu0 %vm709_vm0, %v708_v0  ;;  %v214_v4 = vld [vmem:[#allocation5] sm:$0xff]  ;;  %v213_v5 = vld [vmem:[%s182_s4] sm:$0xff]  ;;  %v710_v30 = vmov 0   ;;  %s456_s18 = sshll.u32 %s753_s16, 7 }
  0x57   : > { %465 = vmatpush3.msra.mxu0 %v217_v1  ;;  %v220_v7 = vshrl.u32 %v219_v6, 7  ;;  %v218_v9 = vld [vmem:[#allocation7] sm:$0x1f]  ;;  %s212_s20 = scalar_lea.vmem [#allocation8], %s450_s26  ;;  %s870_s29 = scalar_lea.hbm %s910_s3, %s456_s18 }
  0x58   : > { %466 = vmatprep.subr.mxu0 %v708_v0  ;;  %vm330_vm2 = vcmp.gt.f32.partialorder %v218_v9, 0.0  ;;  %s353_s25 = sshll.u32 %s212_s20, 4  ;;  %s340_s5 = scalar_lea.sflag [#allocation4], %s850_s24  ;;  %s354_s25 = int_to_ptr.vmem [resolvable:$true] %s353_s25 }
  0x59   : > { %467 = vmatpush3.msra.mxu0 %v216_v2  ;;  %v221_v8 = vsub.s32 0, %v220_v7  ;;  %v316_v21 = vsub.s32 1, %v220_v7  ;;  %v321_v24 = vsub.s32 2, %v220_v7  ;;  %v326_v25 = vsub.s32 3, %v220_v7  ;;  %s633_s6 = scalar_lea.vmem %s354_s25, 128  ;;  %p926_p0 = scmp.ne.s32.totalorder %s920_s10, 0 }
  0x5a   : > { %468 = vmatprep.subr.mxu0 %v708_v0  ;;  %v334_v28 = vsub.s32 4, %v220_v7  ;;  %v331_v31 = vsel %vm330_vm2, 1, %v710_v30  ;;  %p634_p11 = scmp.ne.s32.totalorder %s354_s25, %s633_s6  ;;  %s711_s16 = smov [#allocation8]  }
  0x5b   : > { %469 = vmatpush3.msra.mxu0 %v215_v3  ;;  %v222_v10 = vrot.slane %v218_v9, %v221_v8  ;;  %v317_v23 = vrot.slane %v218_v9, %v316_v21  ;;  %v322_v35 = vrot.slane %v218_v9, %v321_v24  ;;  %v327_v36 = vrot.slane %v218_v9, %v326_v25  ;;  %s637_s8 = sshll.u32 %s711_s16, 4  ;;  %s638_s8 = int_to_ptr.vmem [resolvable:$false] %s637_s8 }
  0x5c   : > { %470 = vmatprep.subr.mxu0 %v708_v0  ;;  %v335_v38 = vrot.slane %v331_v31, %v334_v28  ;;  %p635_p1 = pnand %p634_p11, %p926_p0  ;;  %s639_s9 = scalar_lea.vmem %s638_s8, 256 }
  0x5d   : > { %471 = vmatpush3.msra.mxu0 %v214_v4  ;;  %p640_p6 = scmp.lt.s32.totalorder %s354_s25, %s638_s8  ;;  %p641_p12 = scmp.lt.s32.totalorder %s639_s9, %s633_s6 }
  0x5e   : > { %473 = vmatmul.mubr.msk.f32.vlgmr.msra.gmra.mxu0 %vm223_vm1, %v213_v5  ;;  %vm336_vm4 = vcmp.eq.s32.totalorder %v335_v38, 1  ;;  %p636_p2 = pneg %p635_p1 }
  0x5f   : > { %p642_p7 = por %p641_p12, %p640_p6 }
  0x61   : > { %p643_p9 = pnand %p642_p7, %p636_p2 }
 0x11e   : > { %v293_v11 = vpop.f32.mrf.mxu0 }
 0x11f   : > { %v294_v12 = vadd.f32 %v293_v11, %v222_v10 }
 0x120   : > { %v474_v13 = vpop.f32.mrf.mxu0 }
 0x121   : > { %v297_v14 = vand.u32 2147483647, %v294_v12  ;;  %vm309_vm3 = vcmp.ge.f32.partialorder %v294_v12, 0.0 }
 0x123   : > { %v298_v15 = vsub.f32 0.0, %v297_v14 }
 0x125   : > { %v299_v16 = vmul.f32 1.442695, %v298_v15 }
 0x127   : > { %547 = vpow2.f32 %v299_v16 }
 0x134   : > { %v548_v17 = vpop.eup %547 }
 0x135   : > { %v301_v18 = vmul.f32 %v548_v17, %v548_v17  ;;  %v302_v19 = vadd.f32 1.0, %v548_v17 }
 0x137   : > { %549 = vrcp.f32 %v302_v19  ;;  %v306_v20 = vadd.f32 1.0, %v301_v18  ;;  %v305_v26 = vsub.f32 1.0, %v301_v18 }
 0x139   : > { %551 = vrcp.f32 %v306_v20 }
 0x144   : > { %v550_v22 = vpop.eup %549 }
 0x145   : > { %v310_v27 = vsub.f32 1.0, %v550_v22 }
 0x146   : > { %v552_v29 = vpop.eup %551 }
 0x147   : > { %v308_v32 = vmul.f32 %v552_v29, %v305_v26  ;;  %v311_v33 = vsel %vm309_vm3, %v550_v22, %v310_v27 }
 0x148   : > { %v318_v34 = vmul.f32 %v317_v23, %v311_v33 }
 0x149   : > { %v312_v37 = vsub.f32 0.0, %v308_v32 }
 0x14a   : > { %v323_v40 = vadd.f32 %v322_v35, %v318_v34 }
 0x14b   : > { %v313_v39 = vsel %vm309_vm3, %v308_v32, %v312_v37 }
 0x14c   : > { %v328_v41 = vmul.f32 %v327_v36, %v313_v39 }
 0x14e   : > { %v329_v42 = vadd.f32 %v328_v41, %v323_v40 }
 0x150   : > { %v337_v43 = vsel %vm336_vm4, %v329_v42, %v294_v12 }
 0x151   : > { %338 = vst [vmem:[%s212_s20] sm:$0xff] %v337_v43 }
 0x152   : > { %646 = shalt.err (!%p643_p9)
}
 0x153   : > { %s647_s21 = scalar_lea.hbm %s870_s29, 128  ;;  %s651_s23 = scalar_lea.hbm %s910_s3, 256 }
 0x154   : > { %p648_p13 = scmp.ne.s32.totalorder %s870_s29, %s647_s21  ;;  %p652_p4 = scmp.lt.s32.totalorder %s870_s29, %s910_s3 }
 0x155   : > { %p653_p8 = scmp.lt.s32.totalorder %s651_s23, %s647_s21 }
 0x156   : > { %p649_p5 = pnand %p648_p13, %p926_p0 }
 0x157   : > { %p654_p3 = por %p653_p8, %p652_p4 }
 0x158   : > { %p650_p10 = pneg %p649_p5 }
 0x15a   : > { %p655_p11 = pnand %p654_p3, %p650_p10 }
 0x15c   : > { %658 = shalt.err (!%p655_p11)
}
 0x15d   : > { %485 = dma.vmem_to_hbm [thread:$0]  (%p926_p0), %s354_s25, 128, %s870_s29, %s340_s5  }
 0x15e PF: > { %s365_s30 = sand.u32 1, %s689_s12   ;;  %p927_p1 = scmp.ne.s32.totalorder %s916_s19, 0 }
 0x15f   : > { %p928_p2 = scmp.ge.s32.totalorder %s701_s15, 2  ;;  %s366_s4 = scalar_lea.sflag [#allocation4], %s365_s30 }
 0x161   : > { %p499_p6 = pnand %p928_p2, %p927_p1 }
 0x163   : > { %p500_p12 = pneg %p499_p6 }
 0x165   : > { %684 = dma.done.wait (%p500_p12), %s366_s4, 128  }
 0x166   : > { %686 = vsyncadd (%p500_p12), %s366_s4, 4294967168  ;;  %p17_p7 = scmp.ge.s32.totalorder %s804_s7, 4   ;;  %s929_s12 = smov %s693_s13 }
 0x167   : > { %s930_s13 = smov %s697_s14  ;;  %s931_s14 = smov %s820_s11 }
 0x168   : > { %s932_s15 = smov %s804_s7  ;;  %19 = sbr.rel (!%p17_p7) target bundleno = 6 (0x6), region = 85 }
 0x16d   :  { %371 = vsyncpa [#allocation3], 1 }
 0x16e   :  { %373 = vsyncpa [#allocation3 + $0x1], 1 }
 0x16f   :  { %374 = vsyncpa [#allocation6], 1 }
 0x170   :  { %375 = vsyncpa [#allocation4], 1 }
 0x171   :  { %377 = vsyncpa [#allocation4 + $0x1], 1 }

</bundles_post_ra>
